<compile_context>
chip_gen: v5e
topology: v5e:2x2
jax: 0.10.0
libtpu: 0.0.40
codegen_flags: <defaults>
</compile_context>

<pallas_src>
import functools
import math

import jax
import jax.numpy as jnp
from jax.experimental import pallas as pl
from jax.experimental.pallas import tpu as pltpu


# ----------------------------------------------------------------------------
# Pallas kernel:  out[r, b*D + d] = x[r, b*D + d] + pe[r, d]
# ----------------------------------------------------------------------------
def _pos_enc_add_kernel(x_ref, pe_ref, o_ref, *, batch):
    # x_ref: (TS, B*D) in x.dtype;  pe_ref: (TS, D) in float32.
    # f32 accumulation: required on v5e (no bf16 VALU), free under the DMA
    # bound on v6e/v7x, and matches the PyTorch module's float32 pe buffer.
    x = x_ref[...].astype(jnp.float32)
    pe = pe_ref[...]                                   # (TS, D) f32
    if batch > 1:
        # Replicate PE across the batch inside VMEM (lane concat; no HBM
        # traffic).  pe_rep[:, b*D + d] == pe[:, d].
        pe = jnp.concatenate([pe] * batch, axis=-1)    # (TS, B*D)
    o_ref[...] = (x + pe).astype(o_ref.dtype)


def _choose_row_tile(num_rows, row_bytes, target_block_bytes):
    """Row tile: ~target_block_bytes per x-block, sublane(8)-aligned, and
    capped so the grid has >= 2 steps whenever num_rows > 8 (pipelining +
    v7x cross-core sharding)."""
    if num_rows <= 8:
        return num_rows                               # full extent -> legal
    ts = target_block_bytes // max(row_bytes, 1)
    ts = max(8, min(ts, num_rows))
    # Guarantee at least 2 grid steps.
    half = max(8, (((num_rows + 1) // 2) // 8) * 8)
    ts = min(ts, half)
    return max(8, (ts // 8) * 8)                      # multiple of 8


def _positional_encoder_pallas(x, pe_table, *, target_block_bytes=2 << 20,
                               core_parallel=False):
    """Pallas path.  x: (S, B, D); pe_table: (max_len, D).

    core_parallel=True selects pltpu.CORE_PARALLEL on the row axis (v7x
    dual-TensorCore sharding); verify in a trace before enabling in prod.
    """
    S, B, D = x.shape
    if S > pe_table.shape[0]:
        raise ValueError(f"sequence length {S} exceeds pe max_len "
                         f"{pe_table.shape[0]}")
    L = B * D

    # Lane-dense view of x; PE stays (S, D) float32 -- NOT tiled in HBM.
    x_flat = x.reshape(S, L)
    pe = pe_table[:S].astype(jnp.float32)

    row_bytes = L * x.dtype.itemsize
    TS = _choose_row_tile(S, row_bytes, target_block_bytes)
    grid = (pl.cdiv(S, TS),)

    sem = pltpu.CORE_PARALLEL if core_parallel else pltpu.PARALLEL
    kernel = functools.partial(_pos_enc_add_kernel, batch=B)

    out_flat = pl.pallas_call(
        kernel,
        out_shape=jax.ShapeDtypeStruct((S, L), x.dtype),
        grid_spec=pltpu.PrefetchScalarGridSpec(
            num_scalar_prefetch=0,
            grid=grid,
            in_specs=[
                pl.BlockSpec((TS, L), lambda i: (i, 0)),   # x: full-lane slab
                pl.BlockSpec((TS, D), lambda i: (i, 0)),   # pe: (TS, D) only
            ],
            out_specs=pl.BlockSpec((TS, L), lambda i: (i, 0)),
        ),
        # Write the result over x's HBM buffer (no second S*B*D allocation).
        input_output_aliases={0: 0},
        compiler_params=pltpu.CompilerParams(dimension_semantics=(sem,)),
    )(x_flat, pe)

    return out_flat.reshape(S, B, D)


def positional_encoder_forward(x, pe_table, *, min_pallas_bytes=512 * 1024,
                               **kwargs):
    """Dispatch: fused XLA add for tiny tensors, Pallas kernel otherwise.

    x: (S, B, D);  pe_table: (max_len, D).  Eval-mode dropout == identity.
    """
    S = x.shape[0]
    if S > pe_table.shape[0]:
        raise ValueError(f"sequence length {S} exceeds pe max_len "
                         f"{pe_table.shape[0]}")
    if x.size * x.dtype.itemsize < min_pallas_bytes:
        # Launch overhead would dominate; let XLA fuse the broadcasted add.
        pe = pe_table[:S].astype(jnp.float32)[:, None, :]
        return (x.astype(jnp.float32) + pe).astype(x.dtype)
    return _positional_encoder_pallas(x, pe_table, **kwargs)


# ----------------------------------------------------------------------------
# Deterministic buffer construction, mirroring PositionalEncoder.__init__
# ----------------------------------------------------------------------------
def make_pe_table(d_model, max_len=1000, dtype=jnp.float32):
    position = jnp.arange(max_len, dtype=jnp.float32)[:, None]          # (L, 1)
    div_term = jnp.exp(jnp.arange(0, d_model, 2, dtype=jnp.float32)
                       * (-math.log(10000.0) / d_model))                # (ceil(D/2),)
    args = position * div_term                                          # (L, ceil(D/2))
    pe = jnp.zeros((max_len, d_model), dtype=jnp.float32)
    pe = pe.at[:, 0::2].set(jnp.sin(args))
    pe = pe.at[:, 1::2].set(jnp.cos(args)[:, : d_model // 2])           # safe for odd D
    return pe.astype(dtype)                                             # (L, D)


if __name__ == "__main__":
    MAX_LEN = 1000

    # ---- (1) small shapes consistent with the module: seq=8, batch=2, d=32 -
    S, B, D = 8, 2, 32
    key = jax.random.PRNGKey(0)
    x = jax.random.normal(key, (S, B, D), dtype=jnp.float32)
    pe_table = make_pe_table(D, MAX_LEN)
    ref = x + pe_table[:S][:, None, :]

    # Force the Pallas kernel even at this tiny size (the dispatcher would
    # normally route it to fused XLA) and check against the reference.
    out = jax.block_until_ready(_positional_encoder_pallas(x, pe_table))
    assert out.shape == (S, B, D)
    assert jnp.allclose(out, ref, atol=1e-6), "pallas path mismatch vs reference"

    # ---- (2) dispatch wrapper: tiny input takes the fused-XLA fallback -----
    out2 = jax.block_until_ready(positional_encoder_forward(x, pe_table))
    assert jnp.allclose(out2, ref, atol=1e-6), "fallback path mismatch vs reference"

    # ---- (3) multi-step, lane-dense tiled grid (default 2 MiB blocks) ------
    S2, B2, D2 = 512, 4, 128
    x2 = jax.random.normal(jax.random.PRNGKey(1), (S2, B2, D2), dtype=jnp.float32)
    pe2 = make_pe_table(D2, MAX_LEN)
    ref3 = x2 + pe2[:S2][:, None, :]                  # reference before kernel
    out3 = jax.block_until_ready(_positional_encoder_pallas(x2, pe2))
    assert jnp.allclose(out3, ref3, atol=1e-6), "tiled pallas path mismatch"

    # ---- (4) bf16 activations (f32-accumulated add, PE kept in f32) --------
    x4 = x2.astype(jnp.bfloat16)
    ref4 = (x4.astype(jnp.float32) + pe2[:S2][:, None, :]).astype(jnp.bfloat16)
    out4 = jax.block_until_ready(_positional_encoder_pallas(x4, pe2))
    assert out4.dtype == jnp.bfloat16
    assert jnp.allclose(out4.astype(jnp.float32), ref4.astype(jnp.float32),
                        atol=1e-2), "bf16 pallas path mismatch"

    print("KERNEL_OK")
</pallas_src>

<mosaic_0001>
module attributes {stable_mosaic.version = 11 : i64} {
  func.func @_pos_enc_add_kernel(%arg0: i32, %arg1: memref<8x64xf32, #tpu.memory_space<vmem>>, %arg2: memref<8x32xf32, #tpu.memory_space<vmem>>, %arg3: memref<8x64xf32, #tpu.memory_space<vmem>>) attributes {dimension_semantics = [#tpu.dimension_semantics<parallel>], iteration_bounds = array<i64: 1>, scalar_prefetch = 0 : i64, scratch_operands = 0 : i64, tpu.core_type = #tpu.core_type<tc>, window_params = [{transform_indices = @transform_0, window_bounds = array<i64: 8, 64>}, {transform_indices = @transform_1, window_bounds = array<i64: 8, 32>}, {transform_indices = @transform_2, window_bounds = array<i64: 8, 64>}]} {
    %c0 = arith.constant 0 : index
    %c0_0 = arith.constant 0 : index
    %0 = vector.load %arg1[%c0, %c0_0] : memref<8x64xf32, #tpu.memory_space<vmem>>, vector<8x64xf32>
    %c0_1 = arith.constant 0 : index
    %c0_2 = arith.constant 0 : index
    %1 = vector.load %arg2[%c0_1, %c0_2] : memref<8x32xf32, #tpu.memory_space<vmem>>, vector<8x32xf32>
    %2 = tpu.concatenate %1, %1 in 1 : vector<8x32xf32>, vector<8x32xf32> -> vector<8x64xf32>
    %3 = arith.addf %0, %2 : vector<8x64xf32>
    %c0_3 = arith.constant 0 : index
    %c0_4 = arith.constant 0 : index
    %4 = vector.load %arg3[%c0_3, %c0_4] : memref<8x64xf32, #tpu.memory_space<vmem>>, vector<8x64xf32>
    tpu.vector_store %arg3[%c0_3, %c0_4], %3 {strides = array<i32>} : memref<8x64xf32, #tpu.memory_space<vmem>>, vector<8x64xf32>,
    return
  }
  func.func @transform_0(%arg0: i32) -> (i32, i32) {
    %c0_i32 = arith.constant 0 : i32
    %c0_i32_0 = arith.constant 0 : i32
    return %arg0, %c0_i32 : i32, i32
  }
  func.func @transform_1(%arg0: i32) -> (i32, i32) {
    %c0_i32 = arith.constant 0 : i32
    %c0_i32_0 = arith.constant 0 : i32
    return %arg0, %c0_i32 : i32, i32
  }
  func.func @transform_2(%arg0: i32) -> (i32, i32) {
    %c0_i32 = arith.constant 0 : i32
    %c0_i32_0 = arith.constant 0 : i32
    return %arg0, %c0_i32 : i32, i32
  }
}

</mosaic_0001>

<bundles_post_ra>
// kernel: tpu_custom_call.1
= control target key start
LH: loop header
LB: loop body
LE: loop exit
PB: predicated region body
PF: predicated region fallthrough
CT: control target
= control target key end

     0   :  { %7 = vsyncpa [#allocation3], 0  ;;  %s136_s0 = inlined_call_operand.hbm [shape: f32[8,64], index: 0, kind: input, shape index: {}, may-alias: {0,2}]   ;;  %s137_s1 = inlined_call_operand.vmem [shape: f32[8,32], index: 1, kind: input, shape index: {}]   ;;  %s138_s2 = inlined_call_operand.hbm [shape: f32[8,64], index: 2, kind: output, shape index: {}, may-alias: {0,2}]  }
   0x1   :  { %8 = vsyncpa [#allocation4], 0  ;;  %s14_s11 = sshll.u32 %s136_s0, 4  ;;  %s109_s12 = smov [#allocation2]   ;;  %s15_s11 = int_to_ptr.hbm [resolvable:$true] %s14_s11 }
   0x2   :  { %s16_s13 = sshll.u32 %s109_s12, 4  ;;  %s17_s13 = int_to_ptr.vmem [resolvable:$true] %s16_s13 }
   0x3   :  { %19 = dma.hbm_to_vmem [thread:$0]  %s15_s11, 128, %s17_s13, [#allocation3]  }
   0x4   :  { %105 = dma.done.wait [#allocation3], 128  }
   0x5   :  { %106 = vsyncadd [#allocation3], 4294967168  ;;  %v27_v0 = vld [vmem:[%s137_s1] sm:$0xff]  ;;  %s110_s16 = smov 32   ;;  %vm32_vm0 = vcmask 261120   ;;  %s111_s17 = smov [#allocation5]  }
   0x6   :  { %29 = vrot.lane.b32.xlu0 %v27_v0, %s110_s16  ;;  %v26_v1 = vld [vmem:[#allocation2] sm:$0xff]  ;;  %s42_s18 = sshll.u32 %s111_s17, 4  ;;  %s44_s0 = sshll.u32 %s138_s2, 4  ;;  %vm35_vm1 = vcmask 523264   ;;  %s43_s18 = int_to_ptr.vmem [resolvable:$true] %s42_s18  ;;  %s45_s0 = int_to_ptr.hbm [resolvable:$true] %s44_s0 }
  0x78   :  { %v30_v2 = vpop.permute.xlu0 %29 }
  0x79   :  { %v33_v3 = vsel %vm32_vm0, %v27_v0, %v30_v2 }
  0x7a   :  { %v34_v4 = vadd.f32 %v33_v3, %v26_v1 }
  0x7c   :  { %36 = vst.msk [vmem:[#allocation5] sm:$0xff] %vm35_vm1, %v34_v4 }
  0x7d   :  { %47 = dma.vmem_to_hbm [thread:$0]  %s43_s18, 128, %s45_s0, [#allocation4]  }
  0x7e   :  { %107 = dma.done.wait [#allocation4], 128  }
  0x7f   :  { %108 = vsyncadd [#allocation4], 4294967168 }
  0x80   :  { %52 = vsyncpa [#allocation3], 1 }
  0x81   :  { %53 = vsyncpa [#allocation4], 1 }

</bundles_post_ra>
